<compile_context>
chip_gen: v7x
topology: tpu7x:2x2x1
jax: 0.10.0
libtpu: 0.0.40
codegen_flags: <defaults>
</compile_context>

<pallas_src>
import functools

import jax
import jax.numpy as jnp
from jax import lax
from jax.experimental import pallas as pl
from jax.experimental.pallas import tpu as pltpu


def _round_up(x: int, m: int) -> int:
    return ((x + m - 1) // m) * m


def _attention_kernel(x_ref, vbig_ref, sexp_ref, p_ref, o_ref, *, chunk):
    # x_ref:    (bblk, C*F)  lane-dense block of batch rows (compute dtype)
    # vbig_ref: (C*F, C*I)   kron(I_C, V^T)            -- VMEM-resident across the grid
    # sexp_ref: (C*I, C*F)   kron(I_C, w^T 1_{1xF})    -- resident
    # p_ref:    (C*F, F)     kron(1_{Cx1}, I_F)        -- resident
    # o_ref:    (bblk, F)
    bblk = x_ref.shape[0]
    f_dim = o_ref.shape[-1]
    n_chunks = bblk // chunk

    def body(ci, carry):
        row0 = pl.multiple_of(ci * chunk, chunk)
        xc = x_ref[pl.ds(row0, chunk), :]                                   # (chunk, C*F)

        # (1) per-channel projection + tanh: one lane-dense MXU matmul (block-diag weight).
        t = jnp.tanh(jnp.dot(xc, vbig_ref[...],
                             preferred_element_type=jnp.float32))          # (chunk, C*I)

        # (2) attention scores, already replicated F times along the lanes.
        sc = jnp.dot(t, sexp_ref[...],
                     preferred_element_type=jnp.float32)                   # (chunk, C*F)

        # (3) softmax over channels == full-lane softmax of the replicated scores
        #     (each channel's score appears exactly F times, so the lane sum is F*denom).
        sc = sc - jnp.max(sc, axis=-1, keepdims=True)                      # overflow-safe
        ex = jnp.exp(sc)
        denom = jnp.sum(ex, axis=-1, keepdims=True) * (1.0 / f_dim)        # (chunk, 1)
        inv = pl.reciprocal(denom, approx=True)                            # EUP vrcp
        inv = inv * (2.0 - denom * inv)            # one Newton step -> f32-accurate 1/denom
        a_exp = ex * inv                                                    # (chunk, C*F)

        # (4) weighted channel-sum as one more matmul against an exact 0/1 matrix.
        out = jnp.dot(a_exp * xc.astype(jnp.float32), p_ref[...],
                      preferred_element_type=jnp.float32)                   # (chunk, F)
        o_ref[pl.ds(row0, chunk), :] = out.astype(o_ref.dtype)
        return carry

    lax.fori_loop(0, n_chunks, body, 0)


@functools.partial(jax.jit, static_argnames=("bblk", "chunk", "compute_dtype"))
def attention_layer(x, V, w, *, bblk=512, chunk=64, compute_dtype=jnp.bfloat16):
    """x: (B, C, F), V: (I, F), w: (1, I)  ->  (B, F)."""
    B, C, F = x.shape
    I = V.shape[0]
    CF, CI = C * F, C * I

    # --- block sizing -----------------------------------------------------------------
    # Keep >= 2 grid steps whenever possible (v7x has 2 TensorCores), sublane-multiple
    # block rows, and bblk a multiple of the inner chunk used to bound vreg live ranges.
    bblk = max(8, min(bblk, _round_up(pl.cdiv(B, 2), 8)))
    bblk = _round_up(bblk, 8)
    chunk = _round_up(max(8, min(chunk, bblk)), 8)
    bblk = _round_up(bblk, chunk)
    n_blocks = pl.cdiv(B, bblk)
    Bp = n_blocks * bblk

    # --- lane-dense layout + dtype cast at the HBM boundary ----------------------------
    x2 = x.reshape(B, CF)
    if Bp != B:
        x2 = jnp.pad(x2, ((0, Bp - B), (0, 0)))   # zero rows -> uniform softmax, dropped below
    xk = x2.astype(compute_dtype)

    # Tiny "structure" matrices (built once, VMEM-resident) so the kernel needs no
    # reshapes/transposes: everything is a lane-dense matmul or an elementwise op.
    eye_c = jnp.eye(C, dtype=jnp.float32)
    vbig = jnp.kron(eye_c, V.T.astype(jnp.float32)).astype(compute_dtype)          # (CF, CI)
    sexp = jnp.kron(eye_c, jnp.outer(w.astype(jnp.float32)[0],
                                     jnp.ones((F,), jnp.float32)))                 # (CI, CF)
    pmat = jnp.kron(jnp.ones((C, 1), jnp.float32), jnp.eye(F, dtype=jnp.float32))  # (CF, F)

    # --- explicit VMEM budget (double-buffered blocks + resident weights + slack) ------
    lane = 128
    item = jnp.dtype(compute_dtype).itemsize
    xblk_b = bblk * _round_up(CF, lane) * item
    oblk_b = bblk * _round_up(F, lane) * 4
    wblk_b = (_round_up(CF, 8) * _round_up(CI, lane) * item
              + _round_up(CI, 8) * _round_up(CF, lane) * 4
              + _round_up(CF, 8) * _round_up(F, lane) * 4)
    vmem_bytes = 2 * (xblk_b + oblk_b + wblk_b) + (2 << 20)
    vmem_bytes = min(max(vmem_bytes, 16 << 20), 48 << 20)   # safe on v5e/v6e and v7x's 64 MiB

    cost = pl.CostEstimate(
        flops=2 * Bp * (CF * CI + CI * CF + CF * F),
        transcendentals=Bp * (CI + CF),
        bytes_accessed=(Bp * CF * item + Bp * F * 4
                        + vbig.size * item + (sexp.size + pmat.size) * 4),
    )

    out = pl.pallas_call(
        functools.partial(_attention_kernel, chunk=chunk),
        out_shape=jax.ShapeDtypeStruct((Bp, F), x.dtype),
        grid=(n_blocks,),
        in_specs=[
            pl.BlockSpec((bblk, CF), lambda b: (b, 0)),
            pl.BlockSpec((CF, CI), lambda b: (0, 0)),   # constant index -> VMEM-resident
            pl.BlockSpec((CI, CF), lambda b: (0, 0)),
            pl.BlockSpec((CF, F), lambda b: (0, 0)),
        ],
        out_specs=pl.BlockSpec((bblk, F), lambda b: (b, 0)),
        compiler_params=pltpu.CompilerParams(
            dimension_semantics=("parallel",),
            vmem_limit_bytes=int(vmem_bytes),
        ),
        cost_estimate=cost,
    )(xk, vbig, sexp, pmat)
    return out[:B]


def attention_layer_ref(x, V, w):
    """Pure-JAX reference mirroring the torch math exactly."""
    s2 = jnp.einsum("if,bcf->bic", V, x)                 # V @ x^T : (B, I, C)
    s3 = jnp.tanh(s2)
    s5 = jnp.einsum("oi,bic->boc", w, s3)                # (B, 1, C)
    s6 = jnp.exp(s5)
    s7 = jnp.sum(s6, axis=2, keepdims=True)              # (B, 1, 1)
    a = s6 / s7                                          # softmax over channels
    return jnp.sum(jnp.swapaxes(a, 1, 2) * x, axis=1)    # (B, F)


if __name__ == "__main__":
    B, C = 32, 8                 # batch, n_channels  (block sizing -> 2 parallel grid steps)
    size_in, size_inner = 32, 16

    key = jax.random.PRNGKey(0)
    kx, kw, kv = jax.random.split(key, 3)

    # torch.rand -> uniform [0, 1)
    x = jax.random.uniform(kx, (B, C, size_in), dtype=jnp.float32)
    w = jax.random.uniform(kw, (1, size_inner), dtype=jnp.float32)
    V = jax.random.uniform(kv, (size_inner, size_in), dtype=jnp.float32)

    # Tolerances are set to be robust even if the tiny f32 score matmuls run in
    # reduced-precision MXU passes; in practice agreement is far tighter (~1e-6).
    TOL = 2e-3

    # f32 path: same math as the torch module end-to-end.
    out_f32 = jax.block_until_ready(attention_layer(x, V, w, compute_dtype=jnp.float32))
    ref_f32 = attention_layer_ref(x, V, w)
    assert out_f32.shape == (B, size_in)
    assert jnp.allclose(out_f32, ref_f32, atol=TOL, rtol=TOL), "f32 path mismatch vs reference"

    # Default bf16-input path (halves HBM traffic): compare against the reference fed the
    # same bf16-rounded x / V (all accumulation in both paths is f32).
    out_bf16 = jax.block_until_ready(attention_layer(x, V, w))
    xq = x.astype(jnp.bfloat16).astype(jnp.float32)
    Vq = V.astype(jnp.bfloat16).astype(jnp.float32)
    ref_bf16 = attention_layer_ref(xq, Vq, w)
    assert out_bf16.shape == (B, size_in)
    assert jnp.allclose(out_bf16, ref_bf16, atol=TOL, rtol=TOL), "bf16 path mismatch vs reference"

    print("KERNEL_OK")
</pallas_src>

<mosaic_0001>
module attributes {stable_mosaic.version = 11 : i64} {
  func.func @_attention_kernel(%arg0: i32, %arg1: memref<16x256xf32, #tpu.memory_space<vmem>>, %arg2: memref<256x128xf32, #tpu.memory_space<vmem>>, %arg3: memref<128x256xf32, #tpu.memory_space<vmem>>, %arg4: memref<256x32xf32, #tpu.memory_space<vmem>>, %arg5: memref<16x32xf32, #tpu.memory_space<vmem>>) attributes {dimension_semantics = [#tpu.dimension_semantics<parallel>], iteration_bounds = array<i64: 2>, scalar_prefetch = 0 : i64, scratch_operands = 0 : i64, tpu.core_type = #tpu.core_type<tc>, window_params = [{transform_indices = @transform_0, window_bounds = array<i64: 16, 256>}, {pipeline_mode = #tpu.pipeline_mode<synchronous>, transform_indices = @transform_1, window_bounds = array<i64: 256, 128>}, {pipeline_mode = #tpu.pipeline_mode<synchronous>, transform_indices = @transform_2, window_bounds = array<i64: 128, 256>}, {pipeline_mode = #tpu.pipeline_mode<synchronous>, transform_indices = @transform_3, window_bounds = array<i64: 256, 32>}, {transform_indices = @transform_4, window_bounds = array<i64: 16, 32>}]} {
    %c0_i32 = arith.constant 0 : i32
    %c16_i32 = arith.constant 16 : i32
    %0 = arith.muli %c0_i32, %c16_i32 : i32
    %1 = tpu.assume_multiple %0, 16 : i32
    %2 = arith.index_cast %1 : i32 to index
    %c0 = arith.constant 0 : index
    %3 = vector.load %arg1[%2, %c0] : memref<16x256xf32, #tpu.memory_space<vmem>>, vector<16x256xf32>
    %c0_0 = arith.constant 0 : index
    %c0_1 = arith.constant 0 : index
    %4 = vector.load %arg2[%c0_0, %c0_1] : memref<256x128xf32, #tpu.memory_space<vmem>>, vector<256x128xf32>
    %cst = arith.constant dense<0.000000e+00> : vector<16x128xf32>
    %5 = tpu.matmul %3, %4, %cst {dimension_numbers = #tpu.dot_dimension_numbers<[1], [0], [0], [1], [0, 0, 1, 1], [], []>} : vector<16x256xf32>, vector<256x128xf32>, vector<16x128xf32> -> vector<16x128xf32>
    %6 = math.tanh %5 : vector<16x128xf32>
    %c0_2 = arith.constant 0 : index
    %c0_3 = arith.constant 0 : index
    %7 = vector.load %arg3[%c0_2, %c0_3] : memref<128x256xf32, #tpu.memory_space<vmem>>, vector<128x256xf32>
    %cst_4 = arith.constant dense<0.000000e+00> : vector<16x256xf32>
    %8 = tpu.matmul %6, %7, %cst_4 {dimension_numbers = #tpu.dot_dimension_numbers<[1], [0], [0], [1], [0, 0, 1, 1], [], []>} : vector<16x128xf32>, vector<128x256xf32>, vector<16x256xf32> -> vector<16x256xf32>
    %cst_5 = arith.constant dense<0xFF800000> : vector<16xf32>
    %9 = vector.multi_reduction <maximumf>, %8, %cst_5 [1] : vector<16x256xf32> to vector<16xf32>
    %10 = vector.shape_cast %9 : vector<16xf32> to vector<16x1xf32>
    %11 = vector.broadcast %10 : vector<16x1xf32> to vector<16x256xf32>
    %12 = arith.subf %8, %11 : vector<16x256xf32>
    %13 = math.exp %12 : vector<16x256xf32>
    %cst_6 = arith.constant dense<0.000000e+00> : vector<16xf32>
    %14 = vector.multi_reduction <add>, %13, %cst_6 [1] : vector<16x256xf32> to vector<16xf32>
    %15 = vector.shape_cast %14 : vector<16xf32> to vector<16x1xf32>
    %cst_7 = arith.constant 3.125000e-02 : f32
    %16 = vector.broadcast %cst_7 : f32 to vector<16x1xf32>
    %17 = arith.mulf %15, %16 : vector<16x1xf32>
    %18 = tpu.reciprocal %17 {approx = true} : vector<16x1xf32> -> vector<16x1xf32>
    %19 = arith.mulf %17, %18 : vector<16x1xf32>
    %cst_8 = arith.constant 2.000000e+00 : f32
    %20 = vector.broadcast %cst_8 : f32 to vector<16x1xf32>
    %21 = arith.subf %20, %19 : vector<16x1xf32>
    %22 = arith.mulf %18, %21 : vector<16x1xf32>
    %23 = vector.broadcast %22 : vector<16x1xf32> to vector<16x256xf32>
    %24 = arith.mulf %13, %23 : vector<16x256xf32>
    %25 = arith.mulf %24, %3 : vector<16x256xf32>
    %c0_9 = arith.constant 0 : index
    %c0_10 = arith.constant 0 : index
    %26 = vector.load %arg4[%c0_9, %c0_10] : memref<256x32xf32, #tpu.memory_space<vmem>>, vector<256x32xf32>
    %cst_11 = arith.constant dense<0.000000e+00> : vector<16x32xf32>
    %27 = tpu.matmul %25, %26, %cst_11 {dimension_numbers = #tpu.dot_dimension_numbers<[1], [0], [0], [1], [0, 0, 1, 1], [], []>} : vector<16x256xf32>, vector<256x32xf32>, vector<16x32xf32> -> vector<16x32xf32>
    %28 = arith.index_cast %1 : i32 to index
    %c0_12 = arith.constant 0 : index
    %29 = vector.load %arg5[%28, %c0_12] : memref<16x32xf32, #tpu.memory_space<vmem>>, vector<16x32xf32>
    tpu.vector_store %arg5[%28, %c0_12], %27 {strides = array<i32>} : memref<16x32xf32, #tpu.memory_space<vmem>>, vector<16x32xf32>,
    %c1_i32 = arith.constant 1 : i32
    return
  }
  func.func @transform_0(%arg0: i32) -> (i32, i32) {
    %c0_i32 = arith.constant 0 : i32
    %c0_i32_0 = arith.constant 0 : i32
    return %arg0, %c0_i32 : i32, i32
  }
  func.func @transform_1(%arg0: i32) -> (i32, i32) {
    %c0_i32 = arith.constant 0 : i32
    %c0_i32_0 = arith.constant 0 : i32
    %c0_i32_1 = arith.constant 0 : i32
    return %c0_i32, %c0_i32_0 : i32, i32
  }
  func.func @transform_2(%arg0: i32) -> (i32, i32) {
    %c0_i32 = arith.constant 0 : i32
    %c0_i32_0 = arith.constant 0 : i32
    %c0_i32_1 = arith.constant 0 : i32
    return %c0_i32, %c0_i32_0 : i32, i32
  }
  func.func @transform_3(%arg0: i32) -> (i32, i32) {
    %c0_i32 = arith.constant 0 : i32
    %c0_i32_0 = arith.constant 0 : i32
    %c0_i32_1 = arith.constant 0 : i32
    return %c0_i32, %c0_i32_0 : i32, i32
  }
  func.func @transform_4(%arg0: i32) -> (i32, i32) {
    %c0_i32 = arith.constant 0 : i32
    %c0_i32_0 = arith.constant 0 : i32
    return %arg0, %c0_i32 : i32, i32
  }
}

</mosaic_0001>

<bundles_post_ra>
// kernel: attention_layer.1
= control target key start
LH: loop header
LB: loop body
LE: loop exit
PB: predicated region body
PF: predicated region fallthrough
CT: control target
= control target key end

     0   :  { %9 = vsyncpa [#allocation3], 0  ;;  %s1437_s0 = inlined_call_operand.vmem [shape: f32[32,256], index: 0, kind: input, shape index: {}]   ;;  %s1438_s1 = inlined_call_operand.vmem [shape: f32[256,128], index: 1, kind: input, shape index: {}]   ;;  %s1439_s2 = inlined_call_operand.vmem [shape: f32[128,256], index: 2, kind: input, shape index: {}]   ;;  %s1440_s3 = inlined_call_operand.vmem [shape: f32[256,32], index: 3, kind: input, shape index: {}]   ;;  %s1441_s4 = inlined_call_operand.hbm [shape: f32[32,32], index: 4, kind: output, shape index: {}]  }
   0x1   :  { %11 = vsyncpa [#allocation3 + $0x1], 0  ;;  %s1009_s15 = smov 0   ;;  %s1011_s16 = smov 0  }
   0x2   :  { %s1013_s17 = smov 0   ;;  %s1015_s18 = smov 0  }
   0x3 LB: > { %s1030_s19 = sadd.s32 4294967295, %s978_s18   ;;  %s655_s20 = sadd.s32 4294967294, %s978_s18   ;;  %s978_s18 = sphi %s1015_s18, %s1447_s18   ;;  %s974_s17 = sphi %s1013_s17, %s1446_s17   ;;  %s970_s16 = sphi %s1011_s16, %s1445_s16   ;;  %s966_s15 = sphi %s1009_s15, %s1444_s15  }
   0x4   : > { %s1034_s21 = sadd.s32 1, %s978_s18   ;;  %s113_s22 = sadd.s32 1, %s974_s17 }
   0x5   : > { %s110_s23 = ssub.s32 %s978_s18, %s1034_s21  ;;  %p123_p0 = scmp.ne.s32.totalorder %s974_s17, %s970_s16 }
   0x6   : > { %p111_p1 = scmp.eq.s32.totalorder %s110_s23, 0  ;;  %p124_p2 = scmp.eq.s32.totalorder %s1030_s19, 1 }
   0x7   : > { %p129_p3 = scmp.ne.s32.totalorder %s970_s16, %s966_s15  ;;  %p130_p4 = scmp.eq.s32.totalorder %s655_s20, 1 }
   0x8   : > { %s1045_s24 = scalar_select %p111_p1, %s974_s17, %s113_s22  }
   0x9   : > { %p1047_p5 = por %p124_p2, %p123_p0  ;;  %p1051_p6 = por %p130_p4, %p129_p3 }
   0xa   : > { %p658_p7 = scmp.ge.s32.totalorder %s978_s18, 1  ;;  %p167_p8 = scmp.lt.s32.totalorder %s978_s18, 3 }
   0xc   : > { %p168_p9 = pnand %p658_p7, %p167_p8 }
   0xd   : > { %v225_v0 = vld [vmem:[%s1438_s1 + $0x80] sm:$0xff] (!%p168_p9)  ;;  %v226_v1 = vld [vmem:[%s1438_s1 + $0x88] sm:$0xff] (!%p168_p9)  ;;  %s660_s7 = sshll.u32 (!%p168_p9), %s1030_s19, 1  ;;  %v227_v5 = vld [vmem:[%s1438_s1 + $0x90] sm:$0xff] (!%p168_p9)  ;;  %s191_s22 = sand.u32 (!%p168_p9), 1, %s970_s16   ;;  %vm576_vm0 = vcmask (!%p168_p9), 261120  }
   0xe   : > { %171 = sbr.rel (%p168_p9) target bundleno = 1049 (0x419), region = 36  ;;  %v209_v2 = vld [vmem:[%s1438_s1] sm:$0xff] (!%p168_p9)  ;;  %v746_v3 = vpack.c.bf16 (!%p168_p9), %v226_v1, %v225_v0  ;;  %v210_v4 = vld [vmem:[%s1438_s1 + $0x8] sm:$0xff] (!%p168_p9)  ;;  %v228_v6 = vld [vmem:[%s1438_s1 + $0x98] sm:$0xff] (!%p168_p9)  ;;  %p195_p10 = scmp.lt.s32.totalorder (!%p168_p9), %s660_s7, 3 }
   0xf   : > { %v748_v7 = vpack.c.bf16 (!%p168_p9), %v210_v4, %v209_v2  ;;  %v750_v8 = vpack.c.bf16 (!%p168_p9), %v228_v6, %v227_v5  ;;  %v211_v9 = vld [vmem:[%s1438_s1 + $0x10] sm:$0xff] (!%p168_p9)  ;;  %v212_v10 = vld [vmem:[%s1438_s1 + $0x18] sm:$0xff] (!%p168_p9)  ;;  %v229_v11 = vld [vmem:[%s1438_s1 + $0xa0] sm:$0xff] (!%p168_p9)  ;;  %s669_s28 = sshll.u32 (!%p168_p9), %s1030_s19, 8  ;;  %s1396_s6 = scalar_lea.sflag (!%p168_p9), [#allocation3], %s191_s22 }
  0x10   : > { %747 = vmatprep.subr.bf16.mxu0 (!%p168_p9), %v746_v3  ;;  %v230_v12 = vld [vmem:[%s1438_s1 + $0xa8] sm:$0xff] (!%p168_p9)  ;;  %v752_v13 = vpack.c.bf16 (!%p168_p9), %v212_v10, %v211_v9  ;;  %v213_v15 = vld [vmem:[%s1438_s1 + $0x20] sm:$0xff] (!%p168_p9)  ;;  %v231_v17 = vld [vmem:[%s1438_s1 + $0xb0] sm:$0xff] (!%p168_p9)  ;;  %s1394_s5 = scalar_lea.hbm (!%p168_p9), %s1441_s4, %s669_s28  ;;  %s981_s19 = smov (!%p168_p9), [#allocation2]  }
  0x11   : > { %749 = vmatpush3.bf16.msra.mxu0 (!%p168_p9), %v748_v7  ;;  %v754_v14 = vpack.c.bf16 (!%p168_p9), %v230_v12, %v229_v11  ;;  %v214_v16 = vld [vmem:[%s1438_s1 + $0x28] sm:$0xff] (!%p168_p9)  ;;  %v232_v18 = vld [vmem:[%s1438_s1 + $0xb8] sm:$0xff] (!%p168_p9)  ;;  %v215_v21 = vld [vmem:[%s1438_s1 + $0x30] sm:$0xff] (!%p168_p9)  ;;  %s920_s9 = sshll.u32 (!%p168_p9), %s981_s19, 4  ;;  %s921_s9 = int_to_ptr.vmem [resolvable:$false] %s920_s9 }
  0x12   : > { %751 = vmatprep.subr.bf16.mxu0 (!%p168_p9), %v750_v8  ;;  %v756_v19 = vpack.c.bf16 (!%p168_p9), %v214_v16, %v213_v15  ;;  %v758_v20 = vpack.c.bf16 (!%p168_p9), %v232_v18, %v231_v17  ;;  %v216_v22 = vld [vmem:[%s1438_s1 + $0x38] sm:$0xff] (!%p168_p9)  ;;  %v233_v23 = vld [vmem:[%s1438_s1 + $0xc0] sm:$0xff] (!%p168_p9)  ;;  %v234_v24 = vld [vmem:[%s1438_s1 + $0xc8] sm:$0xff] (!%p168_p9) }
  0x13   : > { %v217_v26 = vld [vmem:[%s1438_s1 + $0x40] sm:$0xff] (!%p168_p9)  ;;  %v218_v27 = vld [vmem:[%s1438_s1 + $0x48] sm:$0xff] (!%p168_p9)  ;;  %v760_v28 = vpack.c.bf16 (!%p168_p9), %v216_v22, %v215_v21  ;;  %v235_v29 = vld [vmem:[%s1438_s1 + $0xd0] sm:$0xff] (!%p168_p9)  ;;  %v762_v34 = vpack.c.bf16 (!%p168_p9), %v234_v24, %v233_v23 }
  0x14   : > { %v236_v30 = vld [vmem:[%s1438_s1 + $0xd8] sm:$0xff] (!%p168_p9)  ;;  %v319_v31 = vld [vmem:[%s1439_s2 + $0x8] sm:$0xff] (!%p168_p9)  ;;  %v318_v33 = vld [vmem:[%s1439_s2] sm:$0xff] (!%p168_p9)  ;;  %v764_v45 = vpack.c.bf16 (!%p168_p9), %v218_v27, %v217_v26 }
  0x15   : > { %s1449_s7 = smov (!%p195_p10, %s660_s7), 3  ;;  %753 = vmatpush3.bf16.msra.mxu0 %v752_v13  ;;  %v321_v32 = vld [vmem:[%s1439_s2 + $0x18] sm:$0xff]  ;;  %v320_v36 = vld [vmem:[%s1439_s2 + $0x10] sm:$0xff]  ;;  %v323_v37 = vld [vmem:[%s1439_s2 + $0x28] sm:$0xff]  ;;  %v766_v49 = vpack.c.bf16 %v236_v30, %v235_v29 }
  0x16   : > { %s668_s10 = sshll.u32 %s1449_s7, 4  ;;  %755 = vmatprep.subr.bf16.mxu0 %v754_v14  ;;  %v778_v35 = vpack.c.bf16 %v321_v32, %v319_v31  ;;  %v325_v38 = vld [vmem:[%s1439_s2 + $0x38] sm:$0xff]  ;;  %v780_v39 = vpack.c.bf16 %v320_v36, %v318_v33  ;;  %v322_v41 = vld [vmem:[%s1439_s2 + $0x20] sm:$0xff]  ;;  %v324_v42 = vld [vmem:[%s1439_s2 + $0x30] sm:$0xff]  ;;  %v980_v36 = vmov 0.0  }
  0x17   : > { %s1103_s23 = scalar_lea.vmem %s1437_s0, %s668_s10  ;;  %v782_v40 = vpack.c.bf16 %v325_v38, %v323_v37  ;;  %v327_v43 = vld [vmem:[%s1439_s2 + $0x48] sm:$0xff]  ;;  %v329_v44 = vld [vmem:[%s1439_s2 + $0x58] sm:$0xff]  ;;  %v219_v46 = vld [vmem:[%s1438_s1 + $0x50] sm:$0xff]  ;;  %v784_v48 = vpack.c.bf16 %v324_v42, %v322_v41  ;;  %414 = vmatprep.mubr.f32.mxu1 %v980_v36  ;;  %s922_s10 = scalar_lea.vmem %s921_s9, 512 }
  0x18   : > { %v1118_v25 = vld [vmem:[%s1103_s23 + $0x8] sm:$0xff]  ;;  %779 = vmatprep.subr.bf16.mxu1 %v778_v35  ;;  %v220_v47 = vld [vmem:[%s1438_s1 + $0x58] sm:$0xff]  ;;  %v237_v50 = vld [vmem:[%s1438_s1 + $0xe0] sm:$0xff]  ;;  %v786_v51 = vpack.c.bf16 %v329_v44, %v327_v43 }
  0x19   : > { %305 = vmatprep.mubr.f32.mxu0 %v1118_v25  ;;  %757 = vmatpush3.bf16.msra.mxu0 %v756_v19  ;;  %v326_v52 = vld [vmem:[%s1439_s2 + $0x40] sm:$0xff]  ;;  %v328_v53 = vld [vmem:[%s1439_s2 + $0x50] sm:$0xff]  ;;  %v238_v54 = vld [vmem:[%s1438_s1 + $0xe8] sm:$0xff]  ;;  %v768_v57 = vpack.c.bf16 %v220_v47, %v219_v46 }
  0x1a   : > { %759 = vmatprep.subr.bf16.mxu0 %v758_v20  ;;  %781 = vmatpush1.bf16.msra.mxu1 %v780_v39  ;;  %v331_v55 = vld [vmem:[%s1439_s2 + $0x68] sm:$0xff]  ;;  %v333_v56 = vld [vmem:[%s1439_s2 + $0x78] sm:$0xff]  ;;  %v221_v58 = vld [vmem:[%s1438_s1 + $0x60] sm:$0xff]  ;;  %v788_v60 = vpack.c.bf16 %v328_v53, %v326_v52  ;;  %v770_v61 = vpack.c.bf16 %v238_v54, %v237_v50 }
  0x1b   : > { %783 = vmatprep.subr.bf16.mxu1 %v782_v40  ;;  %v222_v59 = vld [vmem:[%s1438_s1 + $0x68] sm:$0xff]  ;;  %v239_v62 = vld [vmem:[%s1438_s1 + $0xf0] sm:$0xff]  ;;  %v790_v63 = vpack.c.bf16 %v333_v56, %v331_v55  ;;  %v330_v0 = vld [vmem:[%s1439_s2 + $0x60] sm:$0xff] }
  0x1c   : > { %v332_v1 = vld [vmem:[%s1439_s2 + $0x70] sm:$0xff]  ;;  %v240_v2 = vld [vmem:[%s1438_s1 + $0xf8] sm:$0xff]  ;;  %v335_v3 = vld [vmem:[%s1439_s2 + $0x88] sm:$0xff]  ;;  %v772_v5 = vpack.c.bf16 %v222_v59, %v221_v58 }
  0x1d   : > { %761 = vmatpush3.bf16.msra.mxu0 %v760_v28  ;;  %v337_v4 = vld [vmem:[%s1439_s2 + $0x98] sm:$0xff]  ;;  %v792_v6 = vpack.c.bf16 %v332_v1, %v330_v0  ;;  %v774_v7 = vpack.c.bf16 %v240_v2, %v239_v62  ;;  %v223_v8 = vld [vmem:[%s1438_s1 + $0x70] sm:$0xff]  ;;  %v1218_v12 = vld [vmem:[%s1103_s23] sm:$0xff] }
  0x1e   : > { %763 = vmatprep.subr.bf16.mxu0 %v762_v34  ;;  %785 = vmatpush1.bf16.msra.mxu1 %v784_v48  ;;  %v224_v9 = vld [vmem:[%s1438_s1 + $0x78] sm:$0xff]  ;;  %v794_v10 = vpack.c.bf16 %v337_v4, %v335_v3  ;;  %v1226_v14 = vld [vmem:[%s1103_s23 + $0x10] sm:$0xff]  ;;  %v334_v15 = vld [vmem:[%s1439_s2 + $0x80] sm:$0xff] }
  0x1f   : > { %787 = vmatprep.subr.bf16.mxu1 %v786_v51  ;;  %v776_v11 = vpack.c.bf16 %v224_v9, %v223_v8  ;;  %v1221_v13 = vld [vmem:[%s1103_s23 + $0x18] sm:$0xff]  ;;  %v336_v16 = vld [vmem:[%s1439_s2 + $0x90] sm:$0xff]  ;;  %v339_v18 = vld [vmem:[%s1439_s2 + $0xa8] sm:$0xff]  ;;  %s659_s23 = sshll.u32 %s191_s22, 4 }
  0x20   : > { %v796_v17 = vpack.c.bf16 %v336_v16, %v334_v15  ;;  %v341_v19 = vld [vmem:[%s1439_s2 + $0xb8] sm:$0xff]  ;;  %v338_v21 = vld [vmem:[%s1439_s2 + $0xa0] sm:$0xff]  ;;  %v340_v22 = vld [vmem:[%s1439_s2 + $0xb0] sm:$0xff]  ;;  %s193_s27 = scalar_lea.vmem [#allocation2], %s659_s23 }
  0x21   : > { %765 = vmatpush3.bf16.msra.mxu0 %v764_v45  ;;  %v798_v20 = vpack.c.bf16 %v341_v19, %v339_v18  ;;  %v800_v23 = vpack.c.bf16 %v340_v22, %v338_v21  ;;  %v343_v24 = vld [vmem:[%s1439_s2 + $0xc8] sm:$0xff]  ;;  %v345_v26 = vld [vmem:[%s1439_s2 + $0xd8] sm:$0xff]  ;;  %v342_v28 = vld [vmem:[%s1439_s2 + $0xc0] sm:$0xff]  ;;  %s593_s7 = sshll.u32 %s193_s27, 4  ;;  %s1389_s7 = int_to_ptr.vmem [resolvable:$true] %s593_s7 }
  0x22   : > { %767 = vmatprep.subr.bf16.mxu0 %v766_v49  ;;  %789 = vmatpush1.bf16.msra.mxu1 %v788_v60  ;;  %v802_v27 = vpack.c.bf16 %v345_v26, %v343_v24  ;;  %v344_v29 = vld [vmem:[%s1439_s2 + $0xd0] sm:$0xff]  ;;  %v347_v31 = vld [vmem:[%s1439_s2 + $0xe8] sm:$0xff]  ;;  %v349_v32 = vld [vmem:[%s1439_s2 + $0xf8] sm:$0xff]  ;;  %s916_s8 = scalar_lea.vmem %s1389_s7, 256  ;;  %p923_p0 = scmp.lt.s32.totalorder %s1389_s7, %s921_s9 }
  0x23   : > { %791 = vmatprep.subr.bf16.mxu1 %v790_v63  ;;  %v804_v30 = vpack.c.bf16 %v344_v29, %v342_v28  ;;  %v346_v33 = vld [vmem:[%s1439_s2 + $0xe0] sm:$0xff]  ;;  %v806_v34 = vpack.c.bf16 %v349_v32, %v347_v31  ;;  %v348_v35 = vld [vmem:[%s1439_s2 + $0xf0] sm:$0xff]  ;;  %v486_v53 = vld [vmem:[%s1440_s3 + $0x88] sm:$0xff]  ;;  %p917_p11 = scmp.ne.s32.totalorder %s1389_s7, %s916_s8  ;;  %p924_p1 = scmp.lt.s32.totalorder %s922_s10, %s916_s8 }
  0x24   : > { %v808_v37 = vpack.c.bf16 %v348_v35, %v346_v33  ;;  %v485_v52 = vld [vmem:[%s1440_s3 + $0x80] sm:$0xff]  ;;  %v470_v56 = vld [vmem:[%s1440_s3 + $0x8] sm:$0xff]  ;;  %v488_v58 = vld [vmem:[%s1440_s3 + $0x98] sm:$0xff] }
  0x25   : > { %769 = vmatpush3.bf16.msra.mxu0 %v768_v57  ;;  %v469_v54 = vld [vmem:[%s1440_s3] sm:$0xff]  ;;  %v810_v55 = vpack.c.bf16 %v486_v53, %v485_v52  ;;  %v487_v57 = vld [vmem:[%s1440_s3 + $0x90] sm:$0xff]  ;;  %v472_v62 = vld [vmem:[%s1440_s3 + $0x18] sm:$0xff]  ;;  %p918_p12 = pnand %p917_p11, %p1047_p5  ;;  %p925_p2 = por %p924_p1, %p923_p0 }
  0x26   : > { %771 = vmatprep.subr.bf16.mxu0 %v770_v61  ;;  %793 = vmatpush1.bf16.msra.mxu1 %v792_v6  ;;  %v812_v59 = vpack.c.bf16 %v470_v56, %v469_v54  ;;  %v814_v60 = vpack.c.bf16 %v488_v58, %v487_v57  ;;  %v471_v61 = vld [vmem:[%s1440_s3 + $0x10] sm:$0xff]  ;;  %v489_v19 = vld [vmem:[%s1440_s3 + $0xa0] sm:$0xff]  ;;  %v494_v33 = vld [vmem:[%s1440_s3 + $0xc8] sm:$0xff] }
  0x27   : > { %795 = vmatprep.subr.bf16.mxu1 %v794_v10  ;;  %v816_v63 = vpack.c.bf16 %v472_v62, %v471_v61  ;;  %v473_v22 = vld [vmem:[%s1440_s3 + $0x20] sm:$0xff]  ;;  %v491_v26 = vld [vmem:[%s1440_s3 + $0xb0] sm:$0xff]  ;;  %v484_v54 = vld [vmem:[%s1440_s3 + $0x78] sm:$0xff]  ;;  %p919_p13 = pneg %p918_p12 }
  0x28   : > { %v475_v29 = vld [vmem:[%s1440_s3 + $0x30] sm:$0xff]  ;;  %v493_v32 = vld [vmem:[%s1440_s3 + $0xc0] sm:$0xff] }
  0x29   : > { %773 = vmatpush3.bf16.msra.mxu0 %v772_v5  ;;  %v477_v35 = vld [vmem:[%s1440_s3 + $0x40] sm:$0xff]  ;;  %v483_v53 = vld [vmem:[%s1440_s3 + $0x70] sm:$0xff]  ;;  %p926_p3 = pnand %p925_p2, %p919_p13 }
  0x2a   : > { %775 = vmatprep.subr.bf16.mxu0 %v774_v7  ;;  %797 = vmatpush1.bf16.msra.mxu1 %v796_v17 }
  0x2b   : > { %799 = vmatprep.subr.bf16.mxu1 %v798_v20  ;;  %v490_v20 = vld [vmem:[%s1440_s3 + $0xa8] sm:$0xff] }
  0x2c   : > { %v818_v21 = vpack.c.bf16 %v490_v20, %v489_v19 }
  0x2d   : > { %777 = vmatpush3.bf16.msra.mxu0 %v776_v11 }
  0x2e   : > { %801 = vmatpush1.bf16.msra.mxu1 %v800_v23  ;;  %811 = vmatprep.subr.bf16.mxu0 %v810_v55  ;;  %v474_v23 = vld [vmem:[%s1440_s3 + $0x28] sm:$0xff] }
  0x2f   : > { %803 = vmatprep.subr.bf16.mxu1 %v802_v27  ;;  %v820_v24 = vpack.c.bf16 %v474_v23, %v473_v22  ;;  %v492_v27 = vld [vmem:[%s1440_s3 + $0xb8] sm:$0xff] }
  0x30   : > { %306 = vmatmul.mubr.f32.vlgmr.msra.gmra.mrb[0].mxu0 %v1218_v12  ;;  %v822_v28 = vpack.c.bf16 %v492_v27, %v491_v26 }
  0x31   : > { %310 = vmatprep.mubr.f32.mxu0 %v1221_v13  ;;  %813 = vmatpush3.bf16.msra.mxu0 %v812_v59 }
  0x32   : > { %805 = vmatpush1.bf16.msra.mxu1 %v804_v30  ;;  %815 = vmatprep.subr.bf16.mxu0 %v814_v60  ;;  %v476_v30 = vld [vmem:[%s1440_s3 + $0x38] sm:$0xff] }
  0x33   : > { %807 = vmatprep.subr.bf16.mxu1 %v806_v34  ;;  %v824_v31 = vpack.c.bf16 %v476_v30, %v475_v29  ;;  %v826_v34 = vpack.c.bf16 %v494_v33, %v493_v32 }
  0x34   : > { %311 = vmatmul.mubr.f32.gmra.mrb[2].mxu0 %v1226_v14 }
  0x35   : > { %817 = vmatpush3.bf16.msra.mxu0 %v816_v63 }
  0x36   : > { %809 = vmatpush1.bf16.msra.mxu1 %v808_v37  ;;  %819 = vmatprep.subr.bf16.mxu0 %v818_v21 }
  0x37   : > { %842 = vmatprep.subr.bf16.mxu1 %v810_v55  ;;  %v840_v55 = vpack.c.bf16 %v484_v54, %v483_v53 }
  0x39   : > { %821 = vmatpush3.bf16.msra.mxu0 %v820_v24 }
  0x3a   : > { %823 = vmatprep.subr.bf16.mxu0 %v822_v28 }
  0x3d   : > { %825 = vmatpush3.bf16.msra.mxu0 %v824_v31 }
  0x3e   : > { %827 = vmatprep.subr.bf16.mxu0 %v826_v34 }
 0x103   : > { %v702_v38 = vpop.f32.mrb[0].mxu0 }
 0x104   : > { %v703_v39 = vpop.f32.mrb[1].mxu0 }
 0x105   : > { %v704_v40 = vadd.f32 %v703_v39, %v702_v38  ;;  %v495_v38 = vld [vmem:[%s1440_s3 + $0xd0] sm:$0xff]  ;;  %v496_v39 = vld [vmem:[%s1440_s3 + $0xd8] sm:$0xff] }
 0x107   : > { %900 = vtanh.f32 %v704_v40  ;;  %v705_v41 = vpop.f32.mrb[2].mxu0  ;;  %v830_v40 = vpack.c.bf16 %v496_v39, %v495_v38 }
 0x108   : > { %v706_v42 = vpop.f32.mrb[3].mxu0 }
 0x109   : > { %v707_v43 = vadd.f32 %v706_v42, %v705_v41  ;;  %v479_v41 = vld [vmem:[%s1440_s3 + $0x50] sm:$0xff]  ;;  %v480_v42 = vld [vmem:[%s1440_s3 + $0x58] sm:$0xff] }
 0x10b   : > { %902 = vtanh.f32 %v707_v43  ;;  %v832_v43 = vpack.c.bf16 %v480_v42, %v479_v41 }
 0x111   : > { %v901_v44 = vpop.eup %900 }
 0x112   : > { %415 = vmatmul.mubr.f32.vlgmr.msra.gmra.mrb[0].mxu1 %v901_v44  ;;  %v497_v44 = vld [vmem:[%s1440_s3 + $0xe0] sm:$0xff] }
 0x113   : > { %420 = vmatprep.mubr.f32.mxu1 %v980_v36  ;;  %850 = vmatpush3.bf16.msra.mxu1 %v812_v59  ;;  %v478_v36 = vld [vmem:[%s1440_s3 + $0x48] sm:$0xff] }
 0x114   : > { %843 = vmatprep.subr.bf16.mxu1 %v814_v60  ;;  %v828_v37 = vpack.c.bf16 %v478_v36, %v477_v35 }
 0x115   : > { %v903_v45 = vpop.eup %902 }
 0x116   : > { %421 = vmatmul.mubr.f32.gmra.mrb[2].mxu1 %v903_v45  ;;  %829 = vmatpush3.bf16.msra.mxu0 %v828_v37  ;;  %v498_v45 = vld [vmem:[%s1440_s3 + $0xe8] sm:$0xff] }
 0x117   : > { %851 = vmatpush3.bf16.msra.mxu1 %v816_v63  ;;  %831 = vmatprep.subr.bf16.mxu0 %v830_v40 }
 0x118   : > { %844 = vmatprep.subr.bf16.mxu1 %v818_v21 }
 0x11a   : > { %833 = vmatpush3.bf16.msra.mxu0 %v832_v43 }
 0x11b   : > { %852 = vmatpush3.bf16.msra.mxu1 %v820_v24 }
 0x11c   : > { %845 = vmatprep.subr.bf16.mxu1 %v822_v28 }
 0x11f   : > { %853 = vmatpush3.bf16.msra.mxu1 %v824_v31 }
 0x120   : > { %846 = vmatprep.subr.bf16.mxu1 %v826_v34 }
 0x123   : > { %854 = vmatpush3.bf16.msra.mxu1 %v828_v37 }
 0x124   : > { %847 = vmatprep.subr.bf16.mxu1 %v830_v40 }
 0x127   : > { %855 = vmatpush3.bf16.msra.mxu1 %v832_v43 }
 0x1e5   : > { %v416_v46 = vpop.f32.mrb[0].mxu1 }
 0x1e6   : > { %v418_v47 = vpop.f32.mrb[1].mxu1 }
 0x1e7   : > { %v427_v48 = vmax.f32 %v416_v46, %v418_v47 }
 0x1e9   : > { %428 = vmax.xlane.f32.xlu0 %v427_v48  ;;  %v422_v49 = vpop.f32.mrb[2].mxu1  ;;  %v482_v48 = vld [vmem:[%s1440_s3 + $0x68] sm:$0xff] }
 0x1ea   : > { %v424_v50 = vpop.f32.mrb[3].mxu1 }
 0x1eb   : > { %v430_v51 = vmax.f32 %v422_v49, %v424_v50 }
 0x1ed   : > { %431 = vmax.xlane.f32.xlu0 %v430_v51  ;;  %v500_v51 = vld [vmem:[%s1440_s3 + $0xf8] sm:$0xff] }
 0x276   : > { %v429_v0 = vpop.xlane.xlu0 %428 }
 0x277   : > { %v433_v1 = vsub.f32 %v416_v46, %v429_v0  ;;  %v434_v2 = vsub.f32 %v418_v47, %v429_v0  ;;  %v834_v46 = vpack.c.bf16 %v498_v45, %v497_v44  ;;  %v481_v47 = vld [vmem:[%s1440_s3 + $0x60] sm:$0xff] }
 0x279   : > { %v437_v3 = vmul.f32 1.442695, %v433_v1  ;;  %v439_v4 = vmul.f32 1.442695, %v434_v2  ;;  %835 = vmatprep.subr.bf16.mxu0 %v834_v46  ;;  %848 = vmatprep.subr.bf16.mxu1 %v834_v46 }
 0x27a   : > { %v432_v5 = vpop.xlane.xlu0 %431 }
 0x27b   : > { %904 = vpow2.f32 %v437_v3  ;;  %v435_v6 = vsub.f32 %v422_v49, %v432_v5  ;;  %v436_v7 = vsub.f32 %v424_v50, %v432_v5  ;;  %v836_v49 = vpack.c.bf16 %v482_v48, %v481_v47  ;;  %v499_v50 = vld [vmem:[%s1440_s3 + $0xf0] sm:$0xff] }
 0x27c   : > { %906 = vpow2.f32 %v439_v4  ;;  %v838_v52 = vpack.c.bf16 %v500_v51, %v499_v50 }
 0x27d   : > { %v441_v8 = vmul.f32 1.442695, %v435_v6  ;;  %v443_v9 = vmul.f32 1.442695, %v436_v7  ;;  %837 = vmatpush3.bf16.msra.mxu0 %v836_v49  ;;  %856 = vmatpush3.bf16.msra.mxu1 %v836_v49 }
 0x27e   : > { %839 = vmatprep.subr.bf16.mxu0 %v838_v52  ;;  %849 = vmatprep.subr.bf16.mxu1 %v838_v52 }
 0x27f   : > { %908 = vpow2.f32 %v441_v8 }
 0x280   : > { %910 = vpow2.f32 %v443_v9 }
 0x281   : > { %841 = vmatpush3.bf16.msra.mxu0 %v840_v55  ;;  %857 = vmatpush3.bf16.msra.mxu1 %v840_v55 }
 0x285   : > { %v1295_v10 = vpop.eup %904 }
 0x286   : > { %v1297_v11 = vpop.eup %906 }
 0x287   : > { %v445_v15 = vadd.f32 %v1297_v11, %v1295_v10 }
 0x289   : > { %v1301_v16 = vpop.eup %908  ;;  %446 = vadd.xlane.f32.xlu1 %v445_v15 }
 0x28a   : > { %v1303_v17 = vpop.eup %910 }
 0x28b   : > { %v448_v18 = vadd.f32 %v1303_v17, %v1301_v16 }
 0x28d   : > { %449 = vadd.xlane.f32.xlu1 %v448_v18 }
 0x316   : > { %v447_v56 = vpop.xlane.xlu1 %446 }
 0x317   : > { %v451_v57 = vmul.f32 0.03125, %v447_v56 }
 0x319   : > { %912 = vrcp.f32 %v451_v57 }
 0x31a   : > { %v450_v58 = vpop.xlane.xlu1 %449 }
 0x31b   : > { %v452_v59 = vmul.f32 0.03125, %v450_v58 }
 0x31d   : > { %914 = vrcp.f32 %v452_v59 }
 0x323   : > { %v913_v60 = vpop.eup %912 }
 0x324   : > { %v455_v61 = vmul.f32 %v913_v60, %v451_v57 }
 0x326   : > { %v457_v62 = vsub.f32 2.0, %v455_v61 }
 0x327   : > { %v915_v63 = vpop.eup %914 }
 0x328   : > { %v459_v0 = vmul.f32 %v913_v60, %v457_v62  ;;  %v456_v1 = vmul.f32 %v915_v63, %v452_v59 }
 0x32a   : > { %v461_v2 = vmul.f32 %v1295_v10, %v459_v0  ;;  %v458_v3 = vsub.f32 2.0, %v456_v1  ;;  %v462_v4 = vmul.f32 %v1297_v11, %v459_v0 }
 0x32c   : > { %v465_v5 = vmul.f32 %v461_v2, %v1218_v12  ;;  %v460_v6 = vmul.f32 %v915_v63, %v458_v3  ;;  %v466_v7 = vmul.f32 %v462_v4, %v1118_v25 }
 0x32e   : > { %v463_v8 = vmul.f32 %v1301_v16, %v460_v6  ;;  %565 = vmatprep.mubr.f32.mxu0 %v466_v7  ;;  %v464_v9 = vmul.f32 %v1303_v17, %v460_v6 }
 0x32f   : > { %566 = vmatmul.mubr.f32.vlgmr.msra.gmra.mrb[4].mxu0 %v465_v5 }
 0x330   : > { %v467_v15 = vmul.f32 %v463_v8, %v1226_v14  ;;  %v468_v18 = vmul.f32 %v464_v9, %v1221_v13 }
 0x332   : > { %570 = vmatprep.mubr.f32.mxu1 %v468_v18 }
 0x333   : > { %571 = vmatmul.mubr.f32.vlgmr.msra.gmra.mrb[4].mxu1 %v467_v15 }
 0x402   : > { %v740_v10 = vpop.f32.mrb[4].mxu0 }
 0x403   : > { %v741_v12 = vpop.f32.mrb[5].mxu0 }
 0x404   : > { %v742_v25 = vadd.f32 %v741_v12, %v740_v10 }
 0x406   : > { %577 = vst.msk [vmem:[%s193_s27] sm:$0xff] %vm576_vm0, %v742_v25  ;;  %v743_v11 = vpop.f32.mrb[4].mxu1 }
 0x407   : > { %v744_v13 = vpop.f32.mrb[5].mxu1 }
 0x408   : > { %v745_v14 = vadd.f32 %v744_v13, %v743_v11 }
 0x40a   : > { %578 = vst.msk [vmem:[%s193_s27 + $0x8] sm:$0xff] %vm576_vm0, %v745_v14 }
 0x40b   : > { %929 = shalt.err (!%p926_p3)
}
 0x40c   : > { %s930_s11 = scalar_lea.hbm %s1394_s5, 256  ;;  %s934_s14 = scalar_lea.hbm %s1441_s4, 512 }
 0x40d   : > { %p931_p4 = scmp.ne.s32.totalorder %s1394_s5, %s930_s11  ;;  %p935_p9 = scmp.lt.u32.totalorder %s1394_s5, %s1441_s4 }
 0x40e   : > { %p936_p10 = scmp.lt.u32.totalorder %s934_s14, %s930_s11  ;;  %p938_p12 = scmp.lt.u32.totalorder %s930_s11, %s1394_s5 }
 0x40f   : > { %p932_p7 = pnand %p931_p4, %p1047_p5 }
 0x410   : > { %p937_p11 = por %p936_p10, %p935_p9 }
 0x411   : > { %p933_p8 = pneg %p932_p7 }
 0x412   : > { %p939_p13 = por %p938_p12, %p937_p11 }
 0x414   : > { %p940_p0 = pnand %p939_p13, %p933_p8 }
 0x416   : > { %943 = shalt.err (!%p940_p0)
}
 0x417   : > { %s982_s23 = smov 128   ;;  %s983_s27 = smov 8  }
 0x418   : > { %858 = dma.vmem_to_hbm [thread:$0]  (%p1047_p5), %s1389_s7, 256, %s1394_s5, %s1396_s6, %s982_s23, %s982_s23, %s983_s27  }
 0x419 PF: > { %p864_p1 = scmp.ge.s32.totalorder %s978_s18, 2  ;;  %s608_s28 = sand.u32 1, %s966_s15  }
 0x41a   : > { %s609_s29 = scalar_lea.sflag [#allocation3], %s608_s28 }
 0x41b   : > { %p861_p2 = pnand %p864_p1, %p1051_p6 }
 0x41d   : > { %961 = dma.done.wait (!%p861_p2), %s609_s29, 256  }
 0x41e   : > { %963 = vsyncadd (!%p861_p2), %s609_s29, 4294967040  ;;  %p14_p3 = scmp.ge.s32.totalorder %s1034_s21, 4   ;;  %s1444_s15 = smov %s970_s16 }
 0x41f   : > { %s1445_s16 = smov %s974_s17  ;;  %s1446_s17 = smov %s1045_s24 }
 0x420   : > { %s1447_s18 = smov %s1034_s21  ;;  %16 = sbr.rel (!%p14_p3) target bundleno = 3 (0x3), region = 72 }
 0x427   :  { %614 = vsyncpa [#allocation3], 1 }
 0x428   :  { %616 = vsyncpa [#allocation3 + $0x1], 1 }

</bundles_post_ra>
